<compile_context>
chip_gen: v6e
topology: v6e:2x2x1
jax: 0.10.0
libtpu: 0.0.40
codegen_flags: <defaults>
</compile_context>

<pallas_src>
import jax
import jax.numpy as jnp
from jax.experimental import pallas as pl
from jax.experimental.pallas import tpu as pltpu

# Logical (PyTorch) dims.
IN_DIM = 28 * 28   # 784
H1 = 300
H2 = 100
OUT_DIM = 10

# Lane-padded output dims of each layer (multiples of 128). Layer-1 K (=784)
# is deliberately NOT padded: Mosaic pads K in-vreg, so padding in HBM only
# adds DMA bytes.
H1_PAD = 384       # 300 -> 384
H2_PAD = 128       # 100 -> 128
OUT_PAD = 128      # 10  -> 128


def _round_up(n, m):
    return ((n + m - 1) // m) * m


def _cdiv(a, b):
    return -(-a // b)


def _pick_tb(B):
    """Adaptive batch tile.

    Large enough to amortize the ~0.35 us per-grid-step overhead, small enough
    not to waste MXU/DMA work on tiny batches, and chosen so that B > 8 always
    gives >= 2 grid steps (the 'parallel' axis then splits across v7x's two
    TensorCores).  128-aligned when possible to keep the MXU M dim clean
    (matters most on the MXU-bound v5e).
    """
    B = max(B, 1)
    if B <= 8:
        return 8
    tb = _cdiv(B, 2)                      # guarantees >= 2 grid steps
    tb = _round_up(tb, 128) if tb >= 128 else _round_up(tb, 8)
    return min(tb, 512)                   # cap x double-buffer at ~3.2 MiB VMEM


def fc_kernel(x_ref, w1_ref, w2_ref, w3_ref, o_ref):
    # x_ref : (TB, 784) f32        w1_ref: (784, 384) bf16
    # w2_ref: (384, 128) bf16      w3_ref: (128, 128) bf16
    # o_ref : (TB, 128) bf16
    x = x_ref[...].astype(jnp.bfloat16)                       # cast fused in-kernel
    h1 = jnp.dot(x, w1_ref[...], preferred_element_type=jnp.float32)
    h1 = jnp.maximum(h1, 0.0).astype(jnp.bfloat16)            # ReLU, back to bf16
    h2 = jnp.dot(h1, w2_ref[...], preferred_element_type=jnp.float32)
    h2 = jnp.maximum(h2, 0.0).astype(jnp.bfloat16)            # ReLU, back to bf16
    out = jnp.dot(h2, w3_ref[...], preferred_element_type=jnp.float32)
    o_ref[...] = out.astype(o_ref.dtype)                      # bf16 writeback


def fc_forward(x_nchw, w1_p, w2_p, w3_p):
    """x_nchw: (B, 1, 28, 28) f32.  w*_p: pre-padded bf16 (in, out_pad) weights.

    Returns (B, 10) bf16 logits (== out.squeeze() for B > 1).
    """
    B = x_nchw.shape[0]
    # PyTorch: out = x.view(B, 784, 1, 1); the 1x1 convs are matmuls on (B, 784).
    # reshape of contiguous NCHW is a free metadata op (no HBM pass); the
    # f32->bf16 cast happens inside the kernel (no standalone convert pass).
    x2d = x_nchw.reshape(B, IN_DIM)

    tb = _pick_tb(B)
    grid_b = _cdiv(B, tb)
    # Output rows padded to grid_b * tb so every output block is full (no masked
    # stores).  Rows >= B come from unspecified tail rows of the last x block;
    # this is safe because batch rows are fully independent (no cross-row
    # reduction in the kernel) and they are sliced off below.
    out_rows = grid_b * tb

    out_p = pl.pallas_call(
        fc_kernel,
        out_shape=jax.ShapeDtypeStruct((out_rows, OUT_PAD), jnp.bfloat16),
        grid_spec=pltpu.PrefetchScalarGridSpec(
            num_scalar_prefetch=0,
            grid=(grid_b,),
            in_specs=[
                pl.BlockSpec((tb, IN_DIM), lambda i: (i, 0)),       # streamed per step
                pl.BlockSpec((IN_DIM, H1_PAD), lambda i: (0, 0)),   # VMEM-resident
                pl.BlockSpec((H1_PAD, H2_PAD), lambda i: (0, 0)),   # VMEM-resident
                pl.BlockSpec((H2_PAD, OUT_PAD), lambda i: (0, 0)),  # VMEM-resident
            ],
            out_specs=pl.BlockSpec((tb, OUT_PAD), lambda i: (i, 0)),
        ),
        compiler_params=pltpu.CompilerParams(
            dimension_semantics=("parallel",),  # batch tiles shard across TCs (v7x)
        ),
    )(x2d, w1_p, w2_p, w3_p)

    # Drop batch/lane padding; PyTorch out.squeeze() == (B, 10) for B > 1.
    # TODO(synk): for B == 1 PyTorch squeeze() returns shape (10,); caller can
    # squeeze if exact shape parity is needed.
    return out_p[:B, :OUT_DIM]


def init_params(key):
    """Deterministic synthetic weights (PyTorch conv1x1 weight is (out, in, 1, 1),
    bias=False).

    Returns:
      (w1_f, w2_f, w3_f): unpadded (in, out) f32 transposed weights (reference).
      (w1_p, w2_p, w3_p): lane-padded bf16 kernel weights:
          w1: (784, 384), w2: (384, 128), w3: (128, 128).
      Zero padding is exact: padded h1/h2 columns are relu(0) == 0 and padded
      weight rows multiply those zeros.
    """
    k1, k2, k3 = jax.random.split(key, 3)
    w1 = jax.random.uniform(k1, (H1, IN_DIM), jnp.float32, -1.0, 1.0) * (1.0 / IN_DIM) ** 0.5
    w2 = jax.random.uniform(k2, (H2, H1), jnp.float32, -1.0, 1.0) * (1.0 / H1) ** 0.5
    w3 = jax.random.uniform(k3, (OUT_DIM, H2), jnp.float32, -1.0, 1.0) * (1.0 / H2) ** 0.5

    def pad_t(w, in_pad, out_pad):
        wt = w.T  # (in, out)
        return (jnp.zeros((in_pad, out_pad), jnp.float32)
                .at[:wt.shape[0], :wt.shape[1]].set(wt)
                .astype(jnp.bfloat16))

    w1_p = pad_t(w1, IN_DIM, H1_PAD)   # no K pad on layer 1: x stays (B, 784)
    w2_p = pad_t(w2, H1_PAD, H2_PAD)
    w3_p = pad_t(w3, H2_PAD, OUT_PAD)
    return (w1.T, w2.T, w3.T), (w1_p, w2_p, w3_p)


if __name__ == "__main__":
    key = jax.random.PRNGKey(0)
    kx, kp = jax.random.split(key)

    B = 2
    x = jax.random.normal(kx, (B, 1, 28, 28), jnp.float32)  # NCHW, MNIST-like
    (w1_f, w2_f, w3_f), (w1_p, w2_p, w3_p) = init_params(kp)

    # TODO(synk): parser_args-driven pruning (prune(..., update_thresholds_only=True))
    # has no Pallas equivalent here; the dense forward path is implemented.

    out = fc_forward(x, w1_p, w2_p, w3_p)
    out = jax.block_until_ready(out)

    # Reference check (same bf16-weight / f32-accumulate recipe, plain JAX).
    x2d = x.reshape(B, IN_DIM).astype(jnp.bfloat16)
    ref = jnp.maximum(
        jnp.dot(x2d, w1_f.astype(jnp.bfloat16), preferred_element_type=jnp.float32), 0.0
    ).astype(jnp.bfloat16)
    ref = jnp.maximum(
        jnp.dot(ref, w2_f.astype(jnp.bfloat16), preferred_element_type=jnp.float32), 0.0
    ).astype(jnp.bfloat16)
    ref = jnp.dot(ref, w3_f.astype(jnp.bfloat16), preferred_element_type=jnp.float32)

    out_f32 = out.astype(jnp.float32)
    assert out.shape == (B, OUT_DIM)
    assert jnp.allclose(out_f32, ref, atol=2e-2, rtol=2e-2), (
        f"max abs err {jnp.max(jnp.abs(out_f32 - ref))}")

    print("KERNEL_OK")
</pallas_src>

<mosaic_0001>
module attributes {stable_mosaic.version = 11 : i64} {
  func.func @fc_kernel(%arg0: i32, %arg1: memref<8x784xf32, #tpu.memory_space<vmem>>, %arg2: memref<784x384xbf16, #tpu.memory_space<vmem>>, %arg3: memref<384x128xbf16, #tpu.memory_space<vmem>>, %arg4: memref<128x128xbf16, #tpu.memory_space<vmem>>, %arg5: memref<8x128xbf16, #tpu.memory_space<vmem>>) attributes {dimension_semantics = [#tpu.dimension_semantics<parallel>], iteration_bounds = array<i64: 1>, scalar_prefetch = 0 : i64, scratch_operands = 0 : i64, tpu.core_type = #tpu.core_type<tc>, window_params = [{transform_indices = @transform_0, window_bounds = array<i64: 8, 784>}, {pipeline_mode = #tpu.pipeline_mode<synchronous>, transform_indices = @transform_1, window_bounds = array<i64: 784, 384>}, {pipeline_mode = #tpu.pipeline_mode<synchronous>, transform_indices = @transform_2, window_bounds = array<i64: 384, 128>}, {pipeline_mode = #tpu.pipeline_mode<synchronous>, transform_indices = @transform_3, window_bounds = array<i64: 128, 128>}, {transform_indices = @transform_4, window_bounds = array<i64: 8, 128>}]} {
    %c0 = arith.constant 0 : index
    %c0_0 = arith.constant 0 : index
    %0 = vector.load %arg1[%c0, %c0_0] : memref<8x784xf32, #tpu.memory_space<vmem>>, vector<8x784xf32>
    %1 = arith.truncf %0 : vector<8x784xf32> to vector<8x784xbf16>
    %c0_1 = arith.constant 0 : index
    %c0_2 = arith.constant 0 : index
    %2 = vector.load %arg2[%c0_1, %c0_2] : memref<784x384xbf16, #tpu.memory_space<vmem>>, vector<784x384xbf16>
    %cst = arith.constant dense<0.000000e+00> : vector<8x384xf32>
    %3 = tpu.matmul %1, %2, %cst {dimension_numbers = #tpu.dot_dimension_numbers<[1], [0], [0], [1], [0, 0, 1, 1], [], []>} : vector<8x784xbf16>, vector<784x384xbf16>, vector<8x384xf32> -> vector<8x384xf32>
    %cst_3 = arith.constant 0.000000e+00 : f32
    %4 = vector.broadcast %cst_3 : f32 to vector<8x384xf32>
    %5 = arith.maximumf %3, %4 : vector<8x384xf32>
    %6 = arith.truncf %5 : vector<8x384xf32> to vector<8x384xbf16>
    %c0_4 = arith.constant 0 : index
    %c0_5 = arith.constant 0 : index
    %7 = vector.load %arg3[%c0_4, %c0_5] : memref<384x128xbf16, #tpu.memory_space<vmem>>, vector<384x128xbf16>
    %cst_6 = arith.constant dense<0.000000e+00> : vector<8x128xf32>
    %8 = tpu.matmul %6, %7, %cst_6 {dimension_numbers = #tpu.dot_dimension_numbers<[1], [0], [0], [1], [0, 0, 1, 1], [], []>} : vector<8x384xbf16>, vector<384x128xbf16>, vector<8x128xf32> -> vector<8x128xf32>
    %cst_7 = arith.constant 0.000000e+00 : f32
    %9 = vector.broadcast %cst_7 : f32 to vector<8x128xf32>
    %10 = arith.maximumf %8, %9 : vector<8x128xf32>
    %11 = arith.truncf %10 : vector<8x128xf32> to vector<8x128xbf16>
    %c0_8 = arith.constant 0 : index
    %c0_9 = arith.constant 0 : index
    %12 = vector.load %arg4[%c0_8, %c0_9] : memref<128x128xbf16, #tpu.memory_space<vmem>>, vector<128x128xbf16>
    %cst_10 = arith.constant dense<0.000000e+00> : vector<8x128xf32>
    %13 = tpu.matmul %11, %12, %cst_10 {dimension_numbers = #tpu.dot_dimension_numbers<[1], [0], [0], [1], [0, 0, 1, 1], [], []>} : vector<8x128xbf16>, vector<128x128xbf16>, vector<8x128xf32> -> vector<8x128xf32>
    %14 = arith.truncf %13 : vector<8x128xf32> to vector<8x128xbf16>
    %c0_11 = arith.constant 0 : index
    %c0_12 = arith.constant 0 : index
    %15 = vector.load %arg5[%c0_11, %c0_12] : memref<8x128xbf16, #tpu.memory_space<vmem>>, vector<8x128xbf16>
    tpu.vector_store %arg5[%c0_11, %c0_12], %14 {strides = array<i32>} : memref<8x128xbf16, #tpu.memory_space<vmem>>, vector<8x128xbf16>,
    return
  }
  func.func @transform_0(%arg0: i32) -> (i32, i32) {
    %c0_i32 = arith.constant 0 : i32
    %c0_i32_0 = arith.constant 0 : i32
    return %arg0, %c0_i32 : i32, i32
  }
  func.func @transform_1(%arg0: i32) -> (i32, i32) {
    %c0_i32 = arith.constant 0 : i32
    %c0_i32_0 = arith.constant 0 : i32
    %c0_i32_1 = arith.constant 0 : i32
    return %c0_i32, %c0_i32_0 : i32, i32
  }
  func.func @transform_2(%arg0: i32) -> (i32, i32) {
    %c0_i32 = arith.constant 0 : i32
    %c0_i32_0 = arith.constant 0 : i32
    %c0_i32_1 = arith.constant 0 : i32
    return %c0_i32, %c0_i32_0 : i32, i32
  }
  func.func @transform_3(%arg0: i32) -> (i32, i32) {
    %c0_i32 = arith.constant 0 : i32
    %c0_i32_0 = arith.constant 0 : i32
    %c0_i32_1 = arith.constant 0 : i32
    return %c0_i32, %c0_i32_0 : i32, i32
  }
  func.func @transform_4(%arg0: i32) -> (i32, i32) {
    %c0_i32 = arith.constant 0 : i32
    %c0_i32_0 = arith.constant 0 : i32
    return %arg0, %c0_i32 : i32, i32
  }
}

</mosaic_0001>

<bundles_post_ra>
// kernel: tpu_custom_call.1
= control target key start
LH: loop header
LB: loop body
LE: loop exit
PB: predicated region body
PF: predicated region fallthrough
CT: control target
= control target key end

     0   :  { %9 = vsyncpa [#allocation3], 0  ;;  %s2694_s0 = inlined_call_operand.hbm [shape: f32[2,784], index: 0, kind: input, shape index: {}]   ;;  %s2695_s1 = inlined_call_operand.hbm [shape: bf16[784,384], index: 1, kind: input, shape index: {}]   ;;  %s2696_s2 = inlined_call_operand.hbm [shape: bf16[384,128], index: 2, kind: input, shape index: {}]   ;;  %s2697_s3 = inlined_call_operand.hbm [shape: bf16[128,128], index: 3, kind: input, shape index: {}]   ;;  %s2698_s4 = inlined_call_operand.hbm [shape: bf16[8,128], index: 4, kind: output, shape index: {}]  }
   0x1   :  { %10 = vsyncpa [#allocation6], 0 }
   0x2   :  { %11 = vsyncpa [#allocation9], 0 }
   0x3   :  { %12 = vsyncpa [#allocation4], 0 }
   0x4   :  { %17 = vsyncadd [#allocation3], 672  ;;  %s2584_s15 = smov [#allocation5]  }
   0x5   :  { %s30_s16 = sshll.u32 %s2584_s15, 4  ;;  %s31_s16 = int_to_ptr.vmem [resolvable:$true] %s30_s16 }
   0x6   :  { %s2484_s17 = scalar_lea.vmem %s31_s16, 18816  ;;  %p2489_p1 = scmp.lt.s32.totalorder %s31_s16, %s31_s16 }
   0x7   :  { %p2485_p0 = scmp.ne.s32.totalorder %s31_s16, %s2484_s17  ;;  %p2490_p2 = scmp.lt.s32.totalorder %s2484_s17, %s2484_s17 }
   0x9   :  { %p2491_p3 = por %p2490_p2, %p2489_p1 }
   0xb   :  { %p2492_p4 = pnand %p2491_p3, %p2485_p0 }
   0xd   :  { %2495 = shalt.err (!%p2492_p4)
}
   0xe   :  { %s2585_s18 = smov 192   ;;  %s2586_s19 = smov 12  }
   0xf   :  { %36 = dma.hbm_to_vmem [thread:$0]  %s2695_s1, 18816, %s31_s16, [#allocation6], %s2585_s18, %s2585_s18, %s2586_s19  }
  0x10   :  { %s2587_s22 = smov [#allocation2]  }
  0x11   :  { %s18_s23 = sshll.u32 %s2587_s22, 4  ;;  %s19_s23 = int_to_ptr.vmem [resolvable:$true] %s18_s23 }
  0x12   :  { %s2504_s24 = scalar_lea.vmem %s19_s23, 224  ;;  %s2508_s25 = scalar_lea.vmem %s19_s23, 896 }
  0x13   :  { %p2505_p5 = scmp.ne.s32.totalorder %s19_s23, %s2504_s24  ;;  %p2509_p6 = scmp.lt.s32.totalorder %s19_s23, %s19_s23 }
  0x14   :  { %p2510_p7 = scmp.lt.s32.totalorder %s2508_s25, %s2504_s24 }
  0x16   :  { %p2511_p8 = por %p2510_p7, %p2509_p6 }
  0x18   :  { %p2512_p9 = pnand %p2511_p8, %p2505_p5 }
  0x1a   :  { %2515 = shalt.err (!%p2512_p9)
}
  0x1b   :  { %s2588_s26 = smov 224   ;;  %s2589_s27 = smov 14  }
  0x1c   :  { %24 = dma.hbm_to_vmem [thread:$0]  %s2694_s0, 224, %s19_s23, [#allocation3], %s2588_s26, %s2588_s26, %s2589_s27  }
  0x1d   :  { %s2590_s30 = smov [#allocation7]  }
  0x1e   :  { %s42_s5 = sshll.u32 %s2590_s30, 4  ;;  %s43_s5 = int_to_ptr.vmem [resolvable:$true] %s42_s5 }
  0x1f   :  { %s2524_s1 = scalar_lea.vmem %s43_s5, 3072  ;;  %p2529_p11 = scmp.lt.s32.totalorder %s43_s5, %s43_s5 }
  0x20   :  { %p2525_p10 = scmp.ne.s32.totalorder %s43_s5, %s2524_s1  ;;  %p2530_p12 = scmp.lt.s32.totalorder %s2524_s1, %s2524_s1 }
  0x22   :  { %p2531_p13 = por %p2530_p12, %p2529_p11 }
  0x24   :  { %p2532_p0 = pnand %p2531_p13, %p2525_p10 }
  0x26   :  { %2535 = shalt.err (!%p2532_p0)
}
  0x27   :  { %s2591_s6 = smov 64   ;;  %s2592_s7 = smov 4  }
  0x28   :  { %48 = dma.hbm_to_vmem [thread:$0]  %s2696_s2, 3072, %s43_s5, [#allocation6], %s2591_s6, %s2591_s6, %s2592_s7  }
  0x29   :  { %s2593_s10 = smov [#allocation8]  }
  0x2a   :  { %s54_s11 = sshll.u32 %s2593_s10, 4  ;;  %s55_s11 = int_to_ptr.vmem [resolvable:$true] %s54_s11 }
  0x2b   :  { %s2544_s0 = scalar_lea.vmem %s55_s11, 1024  ;;  %p2549_p2 = scmp.lt.s32.totalorder %s55_s11, %s55_s11 }
  0x2c   :  { %p2545_p1 = scmp.ne.s32.totalorder %s55_s11, %s2544_s0  ;;  %p2550_p3 = scmp.lt.s32.totalorder %s2544_s0, %s2544_s0 }
  0x2e   :  { %p2551_p4 = por %p2550_p3, %p2549_p2 }
  0x30   :  { %p2552_p5 = pnand %p2551_p4, %p2545_p1 }
  0x32   :  { %2555 = shalt.err (!%p2552_p5)
}
  0x33   :  { %60 = dma.hbm_to_vmem [thread:$0]  %s2697_s3, 1024, %s55_s11, [#allocation9], %s2591_s6, %s2591_s6, %s2592_s7  }
  0x34   :  { %2576 = dma.done.wait [#allocation3], 896  }
  0x35   :  { %2577 = vsyncadd [#allocation3], 4294966400 }
  0x36   :  { %2578 = dma.done.wait [#allocation6], 21888  }
  0x37   :  { %2579 = vsyncadd [#allocation6], 4294945408 }
  0x38   :  { %2580 = dma.done.wait [#allocation9], 1024  }
  0x39   :  { %2581 = vsyncadd [#allocation9], 4294966272  ;;  %v2236_v0 = vld [vmem:[#allocation5 + $0xac] ss:$12 sps:$4 sm:$0xff]   ;;  %v2240_v2 = vld [vmem:[#allocation5 + $0xa8] ss:$12 sps:$4 sm:$0xff]   ;;  %v97_v40 = vlaneseq }
  0x3a   :  { %v2238_v1 = vld [vmem:[#allocation5 + $0x22c] ss:$12 sps:$4 sm:$0xff]   ;;  %1159 = vmatprep.subr.bf16.mxu0 %v2236_v0  ;;  %v2241_v3 = vld [vmem:[#allocation5 + $0x228] ss:$12 sps:$4 sm:$0xff]   ;;  %v2246_v6 = vld [vmem:[#allocation5 + $0x90] ss:$12 sps:$4 sm:$0xff]  }
  0x3b   :  { %1200 = vmatprep.subr.bf16.mxu1 %v2238_v1  ;;  %v2242_v4 = vld [vmem:[#allocation5 + $0x94] ss:$12 sps:$4 sm:$0xff]   ;;  %1160 = vmatpush1.bf16.msra.mxu0 %v2240_v2  ;;  %v2247_v7 = vld [vmem:[#allocation5 + $0x210] ss:$12 sps:$4 sm:$0xff]   ;;  %v2252_v10 = vld [vmem:[#allocation5 + $0x78] ss:$12 sps:$4 sm:$0xff]  }
  0x3c   :  { %1201 = vmatpush1.bf16.msra.mxu1 %v2241_v3  ;;  %v2244_v5 = vld [vmem:[#allocation5 + $0x214] ss:$12 sps:$4 sm:$0xff]   ;;  %1161 = vmatprep.subr.bf16.mxu0 %v2242_v4  ;;  %v2248_v8 = vld [vmem:[#allocation5 + $0x7c] ss:$12 sps:$4 sm:$0xff]   ;;  %v2253_v11 = vld [vmem:[#allocation5 + $0x1f8] ss:$12 sps:$4 sm:$0xff]  }
  0x3d   :  { %1202 = vmatprep.subr.bf16.mxu1 %v2244_v5  ;;  %v2250_v9 = vld [vmem:[#allocation5 + $0x1fc] ss:$12 sps:$4 sm:$0xff]   ;;  %v2254_v12 = vld [vmem:[#allocation5 + $0x64] ss:$12 sps:$4 sm:$0xff]   ;;  %v2258_v14 = vld [vmem:[#allocation5 + $0x60] ss:$12 sps:$4 sm:$0xff]  }
  0x3e   :  { %v2256_v13 = vld [vmem:[#allocation5 + $0x1e4] ss:$12 sps:$4 sm:$0xff]   ;;  %v2259_v15 = vld [vmem:[#allocation5 + $0x1e0] ss:$12 sps:$4 sm:$0xff]   ;;  %v2264_v18 = vld [vmem:[#allocation5 + $0x48] ss:$12 sps:$4 sm:$0xff]  }
  0x3f   :  { %1162 = vmatpush1.bf16.msra.mxu0 %v2246_v6  ;;  %v2260_v16 = vld [vmem:[#allocation5 + $0x4c] ss:$12 sps:$4 sm:$0xff]   ;;  %v2265_v19 = vld [vmem:[#allocation5 + $0x1c8] ss:$12 sps:$4 sm:$0xff]   ;;  %v2270_v22 = vld [vmem:[#allocation5 + $0x30] ss:$12 sps:$4 sm:$0xff]  }
  0x40   :  { %1203 = vmatpush1.bf16.msra.mxu1 %v2247_v7  ;;  %1163 = vmatprep.subr.bf16.mxu0 %v2248_v8  ;;  %v2262_v17 = vld [vmem:[#allocation5 + $0x1cc] ss:$12 sps:$4 sm:$0xff]   ;;  %v2266_v20 = vld [vmem:[#allocation5 + $0x34] ss:$12 sps:$4 sm:$0xff]   ;;  %v2271_v23 = vld [vmem:[#allocation5 + $0x1b0] ss:$12 sps:$4 sm:$0xff]  }
  0x41   :  { %1204 = vmatprep.subr.bf16.mxu1 %v2250_v9  ;;  %v2268_v21 = vld [vmem:[#allocation5 + $0x1b4] ss:$12 sps:$4 sm:$0xff]   ;;  %v2272_v24 = vld [vmem:[#allocation5 + $0x1c] ss:$12 sps:$4 sm:$0xff]   ;;  %v2276_v26 = vld [vmem:[#allocation5 + $0x18] ss:$12 sps:$4 sm:$0xff]  }
  0x42   :  { %v2274_v25 = vld [vmem:[#allocation5 + $0x19c] ss:$12 sps:$4 sm:$0xff]   ;;  %v2277_v27 = vld [vmem:[#allocation5 + $0x198] ss:$12 sps:$4 sm:$0xff]   ;;  %v2282_v30 = vld [vmem:[#allocation5] ss:$12 sps:$4 sm:$0xff]  }
  0x43   :  { %1164 = vmatpush1.bf16.msra.mxu0 %v2252_v10  ;;  %v2278_v28 = vld [vmem:[#allocation5 + $0x4] ss:$12 sps:$4 sm:$0xff]   ;;  %v2283_v31 = vld [vmem:[#allocation5 + $0x180] ss:$12 sps:$4 sm:$0xff]   ;;  %v2288_v34 = vld [vmem:[#allocation5 + $0x168] ss:$12 sps:$4 sm:$0xff]  }
  0x44   :  { %1205 = vmatpush1.bf16.msra.mxu1 %v2253_v11  ;;  %1165 = vmatprep.subr.bf16.mxu0 %v2254_v12  ;;  %v2280_v29 = vld [vmem:[#allocation5 + $0x184] ss:$12 sps:$4 sm:$0xff]   ;;  %v2284_v32 = vld [vmem:[#allocation5 + $0x16c] ss:$12 sps:$4 sm:$0xff]   ;;  %v2289_v35 = vld [vmem:[#allocation5 + $0x2e8] ss:$12 sps:$4 sm:$0xff]  }
  0x45   :  { %1206 = vmatprep.subr.bf16.mxu1 %v2256_v13  ;;  %v2286_v33 = vld [vmem:[#allocation5 + $0x2ec] ss:$12 sps:$4 sm:$0xff]   ;;  %v2290_v36 = vld [vmem:[#allocation5 + $0x154] ss:$12 sps:$4 sm:$0xff]   ;;  %v2594_v38 = vmov 1983009808  }
  0x46   :  { %v2292_v37 = vld [vmem:[#allocation5 + $0x2d4] ss:$12 sps:$4 sm:$0xff]   ;;  %v95_v39 = vunpack.c.l.s4 %v2594_v38  ;;  %v2294_v41 = vld [vmem:[#allocation5 + $0x150] ss:$12 sps:$4 sm:$0xff]   ;;  %v98_v46 = vshrl.u32 %v97_v40, 7  ;;  %vm1155_vm0 = vcmask 130048  }
  0x47   :  { %1166 = vmatpush1.bf16.msra.mxu0 %v2258_v14  ;;  %v2295_v42 = vld [vmem:[#allocation5 + $0x2d0] ss:$12 sps:$4 sm:$0xff]   ;;  %v2300_v47 = vld [vmem:[#allocation5 + $0x138] ss:$12 sps:$4 sm:$0xff]   ;;  %v2306_v51 = vld [vmem:[#allocation5 + $0x120] ss:$12 sps:$4 sm:$0xff]  }
  0x48   :  { %1207 = vmatpush1.bf16.msra.mxu1 %v2259_v15  ;;  %1167 = vmatprep.subr.bf16.mxu0 %v2260_v16  ;;  %v2296_v43 = vld [vmem:[#allocation5 + $0x13c] ss:$12 sps:$4 sm:$0xff]   ;;  %v96_v45 = vunpack.c.0.s8 %v95_v39  ;;  %v2301_v48 = vld [vmem:[#allocation5 + $0x2b8] ss:$12 sps:$4 sm:$0xff]   ;;  %v2307_v52 = vld [vmem:[#allocation5 + $0x2a0] ss:$12 sps:$4 sm:$0xff]  }
  0x49   :  { %1208 = vmatprep.subr.bf16.mxu1 %v2262_v17  ;;  %v2298_v44 = vld [vmem:[#allocation5 + $0x2bc] ss:$12 sps:$4 sm:$0xff]   ;;  %v2302_v49 = vld [vmem:[#allocation5 + $0x124] ss:$12 sps:$4 sm:$0xff]   ;;  %v2308_v54 = vld [vmem:[#allocation5 + $0x10c] ss:$12 sps:$4 sm:$0xff]  }
  0x4a   :  { %v2304_v50 = vld [vmem:[#allocation5 + $0x2a4] ss:$12 sps:$4 sm:$0xff]   ;;  %v2636_v53 = vsub.s32 %v96_v45, %v98_v46  ;;  %v2310_v55 = vld [vmem:[#allocation5 + $0x28c] ss:$12 sps:$4 sm:$0xff]   ;;  %v2312_v63 = vld [vmem:[#allocation5 + $0x108] ss:$12 sps:$4 sm:$0xff]  }
  0x4b   :  { %1168 = vmatpush1.bf16.msra.mxu0 %v2264_v18  ;;  %v2332_v56 = vld [vmem:[#allocation2] ss:$14 sps:$4 sm:$0xff]   ;;  %v2334_v57 = vld [vmem:[#allocation2 + $0x1c] ss:$14 sps:$4 sm:$0xff]   ;;  %v2336_v58 = vld [vmem:[#allocation2 + $0x4] ss:$14 sps:$4 sm:$0xff]  }
  0x4c   :  { %1209 = vmatpush1.bf16.msra.mxu1 %v2265_v19  ;;  %1169 = vmatprep.subr.bf16.mxu0 %v2266_v20  ;;  %v2337_v59 = vld [vmem:[#allocation2 + $0x20] ss:$14 sps:$4 sm:$0xff]   ;;  %v100_v60 = vrot.slane %v2332_v56, %v2636_v53  ;;  %v114_v61 = vrot.slane %v2334_v57, %v2636_v53  ;;  %v107_v62 = vrot.slane %v2336_v58, %v2636_v53  ;;  %v2318_v6 = vld [vmem:[#allocation5 + $0xf0] ss:$12 sps:$4 sm:$0xff]   ;;  %v2330_v16 = vld [vmem:[#allocation5 + $0xc0] ss:$12 sps:$4 sm:$0xff]  }
  0x4d   :  { %1210 = vmatprep.subr.bf16.mxu1 %v2268_v21  ;;  %v2313_v0 = vld [vmem:[#allocation5 + $0x288] ss:$12 sps:$4 sm:$0xff]   ;;  %v121_v1 = vrot.slane %v2337_v59, %v2636_v53  ;;  %v2319_v8 = vld [vmem:[#allocation5 + $0x270] ss:$12 sps:$4 sm:$0xff]   ;;  %v2324_v12 = vld [vmem:[#allocation5 + $0xd8] ss:$12 sps:$4 sm:$0xff]  }
  0x4e   :  { %v2314_v2 = vld [vmem:[#allocation5 + $0xf4] ss:$12 sps:$4 sm:$0xff]   ;;  %v123_v3 = vcombine.high %v100_v60, %v114_v61  ;;  %v2320_v10 = vld [vmem:[#allocation5 + $0xdc] ss:$12 sps:$4 sm:$0xff]   ;;  %v2325_v13 = vld [vmem:[#allocation5 + $0x258] ss:$12 sps:$4 sm:$0xff]   ;;  %v122_v18 = vcombine.low %v100_v60, %v114_v61 }
  0x4f   :  { %1170 = vmatpush1.bf16.msra.mxu0 %v2270_v22  ;;  %v2316_v4 = vld [vmem:[#allocation5 + $0x274] ss:$12 sps:$4 sm:$0xff]   ;;  %v125_v5 = vcombine.high %v107_v62, %v121_v1  ;;  %v2322_v11 = vld [vmem:[#allocation5 + $0x25c] ss:$12 sps:$4 sm:$0xff]   ;;  %v2326_v14 = vld [vmem:[#allocation5 + $0xc4] ss:$12 sps:$4 sm:$0xff]   ;;  %v124_v19 = vcombine.low %v107_v62, %v121_v1 }
  0x50   :  { %1211 = vmatpush1.bf16.msra.mxu1 %v2271_v23  ;;  %1171 = vmatprep.subr.bf16.mxu0 %v2272_v24  ;;  %v169_v7 = vpack.c.bf16 %v123_v3, %v123_v3  ;;  %v2328_v15 = vld [vmem:[#allocation5 + $0x244] ss:$12 sps:$4 sm:$0xff]   ;;  %v2331_v17 = vld [vmem:[#allocation5 + $0x240] ss:$12 sps:$4 sm:$0xff]   ;;  %v2645_v22 = vpack.c.bf16 %v122_v18, %v122_v18  ;;  %v2338_v24 = vld [vmem:[#allocation5 + $0x3a8] ss:$12 sps:$4 sm:$0xff]  }
  0x51   :  { %1212 = vmatprep.subr.bf16.mxu1 %v2274_v25  ;;  %v2642_v9 = vpack.c.bf16 %v125_v5, %v125_v5  ;;  %v2340_v20 = vld [vmem:[#allocation5 + $0x3ac] ss:$12 sps:$4 sm:$0xff]   ;;  %v2344_v21 = vld [vmem:[#allocation5 + $0x170] ss:$12 sps:$4 sm:$0xff]   ;;  %v2647_v23 = vpack.c.bf16 %v124_v19, %v124_v19  ;;  %v2343_v25 = vld [vmem:[#allocation5 + $0x394] ss:$12 sps:$4 sm:$0xff]  }
  0x52   :  { %1191 = vmatprep.mubr.bf16.mxu0 %v169_v7  ;;  %v2358_v38 = vld [vmem:[#allocation5 + $0x34c] ss:$12 sps:$4 sm:$0xff]   ;;  %v2364_v39 = vld [vmem:[#allocation5 + $0x110] ss:$12 sps:$4 sm:$0xff]   ;;  %v2356_v40 = vld [vmem:[#allocation5 + $0x348] ss:$12 sps:$4 sm:$0xff]  }
  0x53   :  { %1172 = vmatpush1.bf16.msra.mxu0 %v2276_v26  ;;  %1232 = vmatprep.mubr.bf16.mxu1 %v2642_v9  ;;  %v2345_v26 = vld [vmem:[#allocation5 + $0xb0] ss:$12 sps:$4 sm:$0xff]   ;;  %v2370_v46 = vld [vmem:[#allocation5 + $0x38] ss:$12 sps:$4 sm:$0xff]   ;;  %v2376_v57 = vld [vmem:[#allocation5 + $0x468] ss:$12 sps:$4 sm:$0xff]  }
  0x54   :  { %1213 = vmatpush1.bf16.msra.mxu1 %v2277_v27  ;;  %1173 = vmatprep.subr.bf16.mxu0 %v2278_v28  ;;  %v2349_v27 = vld [vmem:[#allocation5 + $0x158] ss:$12 sps:$4 sm:$0xff]   ;;  %v2341_v28 = vld [vmem:[#allocation5 + $0x390] ss:$12 sps:$4 sm:$0xff]   ;;  %v2383_v58 = vld [vmem:[#allocation5 + $0x454] ss:$12 sps:$4 sm:$0xff]  }
  0x55   :  { %1214 = vmatprep.subr.bf16.mxu1 %v2280_v29  ;;  %v2348_v29 = vld [vmem:[#allocation5 + $0x37c] ss:$12 sps:$4 sm:$0xff]   ;;  %v2389_v60 = vld [vmem:[#allocation5 + $0x2d8] ss:$12 sps:$4 sm:$0xff]   ;;  %v2394_v3 = vld [vmem:[#allocation5 + $0x2c0] ss:$12 sps:$4 sm:$0xff]  }
  0x56   :  { %v2368_v45 = vld [vmem:[#allocation5 + $0x31c] ss:$12 sps:$4 sm:$0xff]   ;;  %v2390_v1 = vld [vmem:[#allocation5 + $0x218] ss:$12 sps:$4 sm:$0xff]   ;;  %vm2597_vm1 = vmmov 0   ;;  %s2598_s2 = smov [#allocation10]  }
  0x57   :  { %1174 = vmatpush1.bf16.msra.mxu0 %v2282_v30  ;;  %v2350_v30 = vld [vmem:[#allocation5 + $0x98] ss:$12 sps:$4 sm:$0xff]   ;;  %v2384_v56 = vld [vmem:[#allocation5 + $0x2f0] ss:$12 sps:$4 sm:$0xff]   ;;  %s1875_s3 = sshll.u32 %s2598_s2, 4  ;;  %s1876_s3 = int_to_ptr.vmem [resolvable:$true] %s1875_s3 }
  0x58   :  { %1215 = vmatpush1.bf16.msra.mxu1 %v2283_v31  ;;  %1175 = vmatprep.subr.bf16.mxu0 %v2284_v32  ;;  %v2354_v31 = vld [vmem:[#allocation5 + $0x140] ss:$12 sps:$4 sm:$0xff]   ;;  %v2346_v32 = vld [vmem:[#allocation5 + $0x378] ss:$12 sps:$4 sm:$0xff]   ;;  %v2385_v59 = vld [vmem:[#allocation5 + $0x230] ss:$12 sps:$4 sm:$0xff]   ;;  %p2561_p7 = scmp.lt.s32.totalorder %s1876_s3, %s1876_s3 }
  0x59   :  { %1216 = vmatprep.subr.bf16.mxu1 %v2286_v33  ;;  %v2353_v33 = vld [vmem:[#allocation5 + $0x364] ss:$12 sps:$4 sm:$0xff]   ;;  %s2556_s14 = scalar_lea.vmem %s1876_s3, 64 }
  0x5a   :  { %v2416_v61 = vld [vmem:[#allocation2 + $0x8] ss:$14 sps:$4 sm:$0xff]   ;;  %v2386_v5 = vld [vmem:[#allocation5 + $0x438] ss:$12 sps:$4 sm:$0xff]   ;;  %p2557_p6 = scmp.ne.s32.totalorder %s1876_s3, %s2556_s14  ;;  %p2562_p8 = scmp.lt.s32.totalorder %s2556_s14, %s2556_s14 }
  0x5b   :  { %1176 = vmatpush2.bf16.msra.mxu0 %v2288_v34  ;;  %v2355_v34 = vld [vmem:[#allocation5 + $0x80] ss:$12 sps:$4 sm:$0xff]   ;;  %v2381_v62 = vld [vmem:[#allocation5 + $0x450] ss:$12 sps:$4 sm:$0xff]   ;;  %v2409_v18 = vld [vmem:[#allocation5 + $0x278] ss:$12 sps:$4 sm:$0xff]  }
  0x5c   :  { %1217 = vmatpush2.bf16.msra.mxu1 %v2289_v35  ;;  %1177 = vmatprep.subr.bf16.mxu0 %v2290_v36  ;;  %v2359_v35 = vld [vmem:[#allocation5 + $0x128] ss:$12 sps:$4 sm:$0xff]   ;;  %v2351_v36 = vld [vmem:[#allocation5 + $0x360] ss:$12 sps:$4 sm:$0xff]   ;;  %v2401_v19 = vld [vmem:[#allocation5 + $0x3f0] ss:$12 sps:$4 sm:$0xff]   ;;  %p2563_p9 = por %p2562_p8, %p2561_p7 }
  0x5d   :  { %1218 = vmatprep.subr.bf16.mxu1 %v2292_v37  ;;  %v2360_v37 = vld [vmem:[#allocation5 + $0x68] ss:$12 sps:$4 sm:$0xff]  }
  0x5e   :  { %p2564_p10 = pnand %p2563_p9, %p2557_p6 }
  0x5f   :  { %1178 = vmatpush2.bf16.msra.mxu0 %v2294_v41  ;;  %v2363_v41 = vld [vmem:[#allocation5 + $0x334] ss:$12 sps:$4 sm:$0xff]  }
  0x60   :  { %1219 = vmatpush2.bf16.msra.mxu1 %v2295_v42  ;;  %1179 = vmatprep.subr.bf16.mxu0 %v2296_v43  ;;  %v2365_v42 = vld [vmem:[#allocation5 + $0x50] ss:$12 sps:$4 sm:$0xff]   ;;  %v2369_v43 = vld [vmem:[#allocation5 + $0xf8] ss:$12 sps:$4 sm:$0xff]  }
  0x61   :  { %1220 = vmatprep.subr.bf16.mxu1 %v2298_v44  ;;  %v2361_v44 = vld [vmem:[#allocation5 + $0x330] ss:$12 sps:$4 sm:$0xff]  }
  0x63   :  { %1180 = vmatpush2.bf16.msra.mxu0 %v2300_v47  ;;  %v2374_v47 = vld [vmem:[#allocation5 + $0xe0] ss:$12 sps:$4 sm:$0xff]  }
  0x64   :  { %1221 = vmatpush2.bf16.msra.mxu1 %v2301_v48  ;;  %1181 = vmatprep.subr.bf16.mxu0 %v2302_v49  ;;  %v2366_v48 = vld [vmem:[#allocation5 + $0x318] ss:$12 sps:$4 sm:$0xff]  }
  0x65   :  { %1222 = vmatprep.subr.bf16.mxu1 %v2304_v50  ;;  %v2373_v49 = vld [vmem:[#allocation5 + $0x304] ss:$12 sps:$4 sm:$0xff]   ;;  %v2375_v50 = vld [vmem:[#allocation5 + $0x20] ss:$12 sps:$4 sm:$0xff]  }
  0x67   :  { %1182 = vmatpush2.bf16.msra.mxu0 %v2306_v51  ;;  %v2379_v51 = vld [vmem:[#allocation5 + $0xc8] ss:$12 sps:$4 sm:$0xff]  }
  0x68   :  { %1223 = vmatpush2.bf16.msra.mxu1 %v2307_v52  ;;  %1183 = vmatprep.subr.bf16.mxu0 %v2308_v54  ;;  %v2371_v52 = vld [vmem:[#allocation5 + $0x300] ss:$12 sps:$4 sm:$0xff]  }
  0x69   :  { %1224 = vmatprep.subr.bf16.mxu1 %v2310_v55  ;;  %v2378_v54 = vld [vmem:[#allocation5 + $0x46c] ss:$12 sps:$4 sm:$0xff]   ;;  %v2380_v55 = vld [vmem:[#allocation5 + $0x8] ss:$12 sps:$4 sm:$0xff]  }
  0x6b   :  { %1184 = vmatpush2.bf16.msra.mxu0 %v2312_v63  ;;  %v2419_v63 = vld [vmem:[#allocation2 + $0x24] ss:$14 sps:$4 sm:$0xff]  }
  0x6c   :  { %1225 = vmatpush2.bf16.msra.mxu1 %v2313_v0  ;;  %1185 = vmatprep.subr.bf16.mxu0 %v2314_v2  ;;  %v2388_v0 = vld [vmem:[#allocation5 + $0x43c] ss:$12 sps:$4 sm:$0xff]   ;;  %v136_v2 = vrot.slane %v2416_v61, %v2636_v53  ;;  %v2440_v61 = vld [vmem:[#allocation5 + $0x320] ss:$12 sps:$4 sm:$0xff]  }
  0x6d   :  { %1226 = vmatprep.subr.bf16.mxu1 %v2316_v4  ;;  %v150_v4 = vrot.slane %v2419_v63, %v2636_v53  ;;  %v2442_v63 = vld [vmem:[#allocation5 + $0x308] ss:$12 sps:$4 sm:$0xff]  }
  0x6f   :  { %1186 = vmatpush2.bf16.msra.mxu0 %v2318_v6  ;;  %v2393_v6 = vld [vmem:[#allocation5 + $0x424] ss:$12 sps:$4 sm:$0xff]  }
  0x70   :  { %1227 = vmatpush2.bf16.msra.mxu1 %v2319_v8  ;;  %1187 = vmatprep.subr.bf16.mxu0 %v2320_v10  ;;  %v2395_v8 = vld [vmem:[#allocation5 + $0x200] ss:$12 sps:$4 sm:$0xff]   ;;  %v2399_v10 = vld [vmem:[#allocation5 + $0x2a8] ss:$12 sps:$4 sm:$0xff]  }
  0x71   :  { %1228 = vmatprep.subr.bf16.mxu1 %v2322_v11 }
  0x73   :  { %1188 = vmatpush2.bf16.msra.mxu0 %v2324_v12  ;;  %v2391_v12 = vld [vmem:[#allocation5 + $0x420] ss:$12 sps:$4 sm:$0xff]  }
  0x74   :  { %1229 = vmatpush2.bf16.msra.mxu1 %v2325_v13  ;;  %1189 = vmatprep.subr.bf16.mxu0 %v2326_v14  ;;  %v2398_v13 = vld [vmem:[#allocation5 + $0x40c] ss:$12 sps:$4 sm:$0xff]   ;;  %v2400_v14 = vld [vmem:[#allocation5 + $0x1e8] ss:$12 sps:$4 sm:$0xff]  }
  0x75   :  { %1230 = vmatprep.subr.bf16.mxu1 %v2328_v15  ;;  %v2396_v15 = vld [vmem:[#allocation5 + $0x408] ss:$12 sps:$4 sm:$0xff]  }
  0x77   :  { %1190 = vmatpush2.bf16.msra.mxu0 %v2330_v16  ;;  %v2403_v16 = vld [vmem:[#allocation5 + $0x3f4] ss:$12 sps:$4 sm:$0xff]  }
  0x78   :  { %1231 = vmatpush2.bf16.msra.mxu1 %v2331_v17  ;;  %1241 = vmatprep.subr.bf16.mxu0 %v2340_v20  ;;  %v2405_v17 = vld [vmem:[#allocation5 + $0x1d0] ss:$12 sps:$4 sm:$0xff]  }
  0x79   :  { %2067 = vmatprep.subr.bf16.mxu1 %v2344_v21  ;;  %v2408_v20 = vld [vmem:[#allocation5 + $0x3dc] ss:$12 sps:$4 sm:$0xff]   ;;  %v2410_v21 = vld [vmem:[#allocation5 + $0x1b8] ss:$12 sps:$4 sm:$0xff]  }
  0x7a   :  { %1192 = vmatmul.mubr.bf16.vlgmr.msra.gmra.mxu0 %v2645_v22 }
  0x7b   :  { %1233 = vmatmul.mubr.bf16.vlgmr.msra.gmra.mxu1 %v2647_v23  ;;  %1242 = vmatpush1.bf16.msra.mxu0 %v2338_v24  ;;  %v2406_v24 = vld [vmem:[#allocation5 + $0x3d8] ss:$12 sps:$4 sm:$0xff]  }
  0x7c   :  { %2068 = vmatpush3.bf16.msra.mxu1 %v2345_v26  ;;  %1243 = vmatprep.subr.bf16.mxu0 %v2343_v25  ;;  %v2415_v25 = vld [vmem:[#allocation5 + $0x1a0] ss:$12 sps:$4 sm:$0xff]   ;;  %v2413_v26 = vld [vmem:[#allocation5 + $0x3c4] ss:$12 sps:$4 sm:$0xff]  }
  0x7d   :  { %2069 = vmatprep.subr.bf16.mxu1 %v2349_v27  ;;  %1355 = vmatprep.mubr.bf16.mxu1 %v169_v7  ;;  %v159_v7 = vcombine.high %v136_v2, %v150_v4  ;;  %v2425_v27 = vld [vmem:[#allocation5 + $0x248] ss:$12 sps:$4 sm:$0xff]  }
  0x7f   :  { %1244 = vmatpush1.bf16.msra.mxu0 %v2341_v28  ;;  %v2655_v11 = vpack.c.bf16 %v159_v7, %v159_v7  ;;  %v2418_v28 = vld [vmem:[#allocation2 + $0xc] ss:$14 sps:$4 sm:$0x33]  }
  0x80   :  { %2070 = vmatpush3.bf16.msra.mxu1 %v2350_v30  ;;  %1245 = vmatprep.subr.bf16.mxu0 %v2348_v29  ;;  %v2421_v29 = vld [vmem:[#allocation2 + $0x28] ss:$14 sps:$4 sm:$0x33]   ;;  %v2411_v30 = vld [vmem:[#allocation5 + $0x3c0] ss:$12 sps:$4 sm:$0xff]  }
  0x81   :  { %2071 = vmatprep.subr.bf16.mxu1 %v2354_v31  ;;  %1273 = vmatprep.mubr.bf16.mxu0 %v2655_v11  ;;  %v2426_v31 = vld [vmem:[#allocation5 + $0x188] ss:$12 sps:$4 sm:$0xff]   ;;  %v2457_v7 = vld [vmem:[#allocation7 + $0x8] sm:$0xff]  }
  0x83   :  { %1246 = vmatpush1.bf16.msra.mxu0 %v2346_v32  ;;  %v158_v32 = vcombine.low %v136_v2, %v150_v4  ;;  %v2452_v2 = vld [vmem:[#allocation7 + $0x58] sm:$0xff]   ;;  %v2454_v4 = vld [vmem:[#allocation7 + $0x50] sm:$0xff]  }
  0x84   :  { %2072 = vmatpush3.bf16.msra.mxu1 %v2355_v34  ;;  %1247 = vmatprep.subr.bf16.mxu0 %v2353_v33  ;;  %v2424_v33 = vld [vmem:[#allocation5 + $0x484] ss:$12 sps:$4 sm:$0xff]   ;;  %v2422_v34 = vld [vmem:[#allocation5 + $0x480] ss:$12 sps:$4 sm:$0xff]  }
  0x85   :  { %2073 = vmatprep.subr.bf16.mxu1 %v2359_v35  ;;  %v143_v35 = vrot.slane %v2418_v28, %v2636_v53 }
  0x87   :  { %1248 = vmatpush1.bf16.msra.mxu0 %v2351_v36  ;;  %v157_v36 = vrot.slane %v2421_v29, %v2636_v53  ;;  %v2428_v53 = vld [vmem:[#allocation5 + $0x3b0] ss:$12 sps:$4 sm:$0xff]  }
  0x88   :  { %2074 = vmatpush3.bf16.msra.mxu1 %v2360_v37  ;;  %1249 = vmatprep.subr.bf16.mxu0 %v2358_v38  ;;  %v2660_v37 = vpack.c.bf16 %v158_v32, %v158_v32  ;;  %v2427_v38 = vld [vmem:[#allocation5 + $0x470] ss:$12 sps:$4 sm:$0xff]  }
  0x89   :  { %2075 = vmatprep.subr.bf16.mxu1 %v2364_v39  ;;  %v2443_v39 = vld [vmem:[#allocation5 + $0x488] ss:$12 sps:$4 sm:$0xff]  }
  0x8b   :  { %1250 = vmatpush1.bf16.msra.mxu0 %v2356_v40  ;;  %v2595_v40 = vmov 0.0  }
  0x8c   :  { %2076 = vmatpush3.bf16.msra.mxu1 %v2365_v42  ;;  %1251 = vmatprep.subr.bf16.mxu0 %v2363_v41  ;;  %v160_v41 = vcombine.low %v143_v35, %v157_v36  ;;  %v2596_v42 = vmov 0  }
  0x8d   :  { %2077 = vmatprep.subr.bf16.mxu1 %v2369_v43 }
  0x8e   :  { %v174_v43 = vpack.c.bf16 %v160_v41, %v160_v41 }
  0x8f   :  { %1252 = vmatpush1.bf16.msra.mxu0 %v2361_v44  ;;  %v2429_v44 = vld [vmem:[#allocation5 + $0x458] ss:$12 sps:$4 sm:$0xff]  }
  0x90   :  { %2078 = vmatpush3.bf16.msra.mxu1 %v2370_v46  ;;  %1253 = vmatprep.subr.bf16.mxu0 %v2368_v45  ;;  %v2444_v45 = vld [vmem:[#allocation7 + $0x78] sm:$0xff]   ;;  %v2430_v46 = vld [vmem:[#allocation5 + $0x398] ss:$12 sps:$4 sm:$0xff]  }
  0x91   :  { %2079 = vmatprep.subr.bf16.mxu1 %v2374_v47  ;;  %v2445_v47 = vld [vmem:[#allocation7 + $0x38] sm:$0xff]  }
  0x93   :  { %1254 = vmatpush1.bf16.msra.mxu0 %v2366_v48  ;;  %v2446_v48 = vld [vmem:[#allocation7 + $0x70] sm:$0xff]  }
  0x94   :  { %2080 = vmatpush3.bf16.msra.mxu1 %v2375_v50  ;;  %1255 = vmatprep.subr.bf16.mxu0 %v2373_v49  ;;  %v2447_v49 = vld [vmem:[#allocation7 + $0x30] sm:$0xff]   ;;  %v2448_v50 = vld [vmem:[#allocation7 + $0x68] sm:$0xff]  }
  0x95   :  { %2081 = vmatprep.subr.bf16.mxu1 %v2379_v51  ;;  %v2432_v51 = vld [vmem:[#allocation5 + $0x380] ss:$12 sps:$4 sm:$0xff]  }
  0x97   :  { %1256 = vmatpush1.bf16.msra.mxu0 %v2371_v52  ;;  %v2433_v52 = vld [vmem:[#allocation5 + $0x428] ss:$12 sps:$4 sm:$0xff]  }
  0x98   :  { %2082 = vmatpush3.bf16.msra.mxu1 %v2380_v55  ;;  %1257 = vmatprep.subr.bf16.mxu0 %v2378_v54  ;;  %v2449_v54 = vld [vmem:[#allocation7 + $0x28] sm:$0xff]   ;;  %v2434_v55 = vld [vmem:[#allocation5 + $0x368] ss:$12 sps:$4 sm:$0xff]  }
  0x99   :  { %2089 = vmatprep.subr.bf16.mxu1 %v2384_v56  ;;  %v2435_v56 = vld [vmem:[#allocation5 + $0x410] ss:$12 sps:$4 sm:$0xff]  }
  0x9b   :  { %1356 = vmatmul.mubr.bf16.vlgmr.msra.gmra.mxu1 %v2645_v22  ;;  %1258 = vmatpush2.bf16.msra.mxu0 %v2376_v57  ;;  %v2414_v22 = vld [vmem:[#allocation5 + $0x260] ss:$12 sps:$4 sm:$0xff]   ;;  %v2436_v57 = vld [vmem:[#allocation5 + $0x350] ss:$12 sps:$4 sm:$0xff]  }
  0x9c   :  { %2090 = vmatpush3.bf16.msra.mxu1 %v2385_v59  ;;  %1259 = vmatprep.subr.bf16.mxu0 %v2383_v58  ;;  %v2437_v58 = vld [vmem:[#allocation5 + $0x3f8] ss:$12 sps:$4 sm:$0xff]  }
  0x9d   :  { %2091 = vmatprep.subr.bf16.mxu1 %v2389_v60  ;;  %1395 = vmatprep.mubr.bf16.mxu1 %v2642_v9  ;;  %v2404_v9 = vld [vmem:[#allocation5 + $0x290] ss:$12 sps:$4 sm:$0xff]   ;;  %v2438_v59 = vld [vmem:[#allocation5 + $0x338] ss:$12 sps:$4 sm:$0xff]   ;;  %v2439_v60 = vld [vmem:[#allocation5 + $0x3e0] ss:$12 sps:$4 sm:$0xff]  }
  0x9f   :  { %1260 = vmatpush2.bf16.msra.mxu0 %v2381_v62  ;;  %v2441_v62 = vld [vmem:[#allocation5 + $0x3c8] ss:$12 sps:$4 sm:$0xff]  }
  0xa0   :  { %2092 = vmatpush3.bf16.msra.mxu1 %v2390_v1  ;;  %1261 = vmatprep.subr.bf16.mxu0 %v2388_v0  ;;  %v2450_v0 = vld [vmem:[#allocation7 + $0x60] sm:$0xff]  }
  0xa1   :  { %2093 = vmatprep.subr.bf16.mxu1 %v2394_v3  ;;  %v2451_v1 = vld [vmem:[#allocation7 + $0x20] sm:$0xff]   ;;  %v2453_v3 = vld [vmem:[#allocation7 + $0x18] sm:$0xff]  }
  0xa3   :  { %1262 = vmatpush2.bf16.msra.mxu0 %v2386_v5  ;;  %v2455_v5 = vld [vmem:[#allocation7 + $0x10] sm:$0xff]  }
  0xa4   :  { %2094 = vmatpush3.bf16.msra.mxu1 %v2395_v8  ;;  %1263 = vmatprep.subr.bf16.mxu0 %v2393_v6  ;;  %v2456_v6 = vld [vmem:[#allocation7 + $0x48] sm:$0xff]   ;;  %v2458_v8 = vld [vmem:[#allocation7 + $0x40] sm:$0xff]  }
  0xa5   :  { %2095 = vmatprep.subr.bf16.mxu1 %v2399_v10  ;;  %v2459_v10 = vld [vmem:[#allocation7] sm:$0xff]  }
  0xa7   :  { %1264 = vmatpush2.bf16.msra.mxu0 %v2391_v12  ;;  %v2461_v12 = vld [vmem:[#allocation7 + $0xb0] sm:$0xff]  }
  0xa8   :  { %2096 = vmatpush3.bf16.msra.mxu1 %v2400_v14  ;;  %1265 = vmatprep.subr.bf16.mxu0 %v2398_v13  ;;  %v2462_v13 = vld [vmem:[#allocation7 + $0xa8] sm:$0xff]   ;;  %v2463_v14 = vld [vmem:[#allocation7 + $0xa0] sm:$0xff]  }
  0xa9   :  { %2097 = vmatprep.subr.bf16.mxu1 %v2404_v9  ;;  %v2464_v9 = vld [vmem:[#allocation7 + $0x98] sm:$0xff]  }
  0xab   :  { %1266 = vmatpush2.bf16.msra.mxu0 %v2396_v15  ;;  %v2465_v15 = vld [vmem:[#allocation7 + $0x90] sm:$0xff]  }
  0xac   :  { %2098 = vmatpush3.bf16.msra.mxu1 %v2405_v17  ;;  %1267 = vmatprep.subr.bf16.mxu0 %v2403_v16  ;;  %v2466_v16 = vld [vmem:[#allocation7 + $0x88] sm:$0xff]   ;;  %v2467_v17 = vld [vmem:[#allocation7 + $0x80] sm:$0xff]  }
  0xad   :  { %2099 = vmatprep.subr.bf16.mxu1 %v2409_v18 }
  0xaf   :  { %1268 = vmatpush2.bf16.msra.mxu0 %v2401_v19 }
  0xb0   :  { %2100 = vmatpush3.bf16.msra.mxu1 %v2410_v21  ;;  %1269 = vmatprep.subr.bf16.mxu0 %v2408_v20 }
  0xb1   :  { %2101 = vmatprep.subr.bf16.mxu1 %v2414_v22 }
  0xb3   :  { %1270 = vmatpush2.bf16.msra.mxu0 %v2406_v24 }
  0xb4   :  { %2102 = vmatpush3.bf16.msra.mxu1 %v2415_v25  ;;  %1271 = vmatprep.subr.bf16.mxu0 %v2413_v26 }
  0xb5   :  { %2103 = vmatprep.subr.bf16.mxu1 %v2425_v27 }
  0xb7   :  { %1272 = vmatpush2.bf16.msra.mxu0 %v2411_v30 }
  0xb8   :  { %2104 = vmatpush3.bf16.msra.mxu1 %v2426_v31  ;;  %1296 = vmatprep.subr.bf16.mxu0 %v2424_v33 }
  0xb9   :  { %2175 = vmatprep.subr.bf16.mxu1 %v2595_v40 }
  0xba   :  { %1274 = vmatmul.mubr.bf16.vlgmr.msra.gmra.mxu0 %v2660_v37 }
  0xbb   :  { %1396 = vmatmul.mubr.bf16.vlgmr.msra.gmra.mxu1 %v2647_v23  ;;  %1297 = vmatpush1.bf16.msra.mxu0 %v2422_v34  ;;  %v2431_v23 = vld [vmem:[#allocation5 + $0x440] ss:$12 sps:$4 sm:$0xff]  }
  0xbc   :  { %1314 = vmatprep.mubr.bf16.mxu0 %v2596_v42  ;;  %2111 = vmatprep.subr.bf16.mxu0 %v2427_v38 }
  0xbd   :  { %2176 = vmatpush3.bf16.msra.mxu1 %v2443_v39  ;;  %2177 = vmatprep.mubr.msk.bf16.mxu1 %vm2597_vm1, %v2595_v40 }
  0xbe   :  { %2135 = vmatprep.subr.bf16.mxu1 %v2444_v45 }
  0xc2   :  { %2033 = vmatmul.mubr.msk.bf16.vlgmr.msra.gmra.mxu0 %vm1155_vm0, %v174_v43 }
  0xc3   :  { %2178 = vmatmul.mubr.msk.bf16.vlgmr.msra.gmra.mxu1 %vm1155_vm0, %v174_v43  ;;  %2112 = vmatpush3.bf16.msra.mxu0 %v2428_v53 }
  0xc4   :  { %1435 = vmatprep.mubr.bf16.mxu0 %v2655_v11  ;;  %2113 = vmatprep.subr.bf16.mxu0 %v2429_v44  ;;  %v2460_v11 = vld [vmem:[#allocation7 + $0xb8] sm:$0xff]  }
  0xc5   :  { %2136 = vmatpush3.bf16.msra.mxu1 %v2445_v47 }
  0xc6   :  { %2137 = vmatprep.subr.bf16.mxu1 %v2446_v48 }
  0xc7   :  { %2114 = vmatpush3.bf16.msra.mxu0 %v2430_v46 }
  0xc8   :  { %2115 = vmatprep.subr.bf16.mxu0 %v2431_v23 }
  0xc9   :  { %2138 = vmatpush3.bf16.msra.mxu1 %v2447_v49 }
  0xca   :  { %2139 = vmatprep.subr.bf16.mxu1 %v2448_v50 }
  0xcb   :  { %2116 = vmatpush3.bf16.msra.mxu0 %v2432_v51 }
  0xcc   :  { %2117 = vmatprep.subr.bf16.mxu0 %v2433_v52 }
  0xcd   :  { %2140 = vmatpush3.bf16.msra.mxu1 %v2449_v54 }
  0xce   :  { %2141 = vmatprep.subr.bf16.mxu1 %v2450_v0 }
  0xcf   :  { %2118 = vmatpush3.bf16.msra.mxu0 %v2434_v55 }
  0xd0   :  { %2119 = vmatprep.subr.bf16.mxu0 %v2435_v56 }
  0xd1   :  { %2142 = vmatpush3.bf16.msra.mxu1 %v2451_v1 }
  0xd2   :  { %2143 = vmatprep.subr.bf16.mxu1 %v2452_v2 }
  0xd3   :  { %2120 = vmatpush3.bf16.msra.mxu0 %v2436_v57 }
  0xd4   :  { %2121 = vmatprep.subr.bf16.mxu0 %v2437_v58 }
  0xd5   :  { %2144 = vmatpush3.bf16.msra.mxu1 %v2453_v3 }
  0xd6   :  { %2145 = vmatprep.subr.bf16.mxu1 %v2454_v4 }
  0xd7   :  { %2122 = vmatpush3.bf16.msra.mxu0 %v2438_v59 }
  0xd8   :  { %2123 = vmatprep.subr.bf16.mxu0 %v2439_v60 }
  0xd9   :  { %2146 = vmatpush3.bf16.msra.mxu1 %v2455_v5  ;;  %v2468_v5 = vld [vmem:[#allocation8 + $0x38] sm:$0xff]  }
  0xda   :  { %2147 = vmatprep.subr.bf16.mxu1 %v2456_v6  ;;  %v2469_v6 = vld [vmem:[#allocation8 + $0x30] sm:$0xff]  }
  0xdb   :  { %2124 = vmatpush3.bf16.msra.mxu0 %v2440_v61 }
  0xdc   :  { %2125 = vmatprep.subr.bf16.mxu0 %v2441_v62 }
  0xdd   :  { %2148 = vmatpush3.bf16.msra.mxu1 %v2457_v7  ;;  %v2470_v7 = vld [vmem:[#allocation8 + $0x28] sm:$0xff]  }
  0xde   :  { %2149 = vmatprep.subr.bf16.mxu1 %v2458_v8  ;;  %v2471_v8 = vld [vmem:[#allocation8 + $0x20] sm:$0xff]  }
  0xdf   :  { %2126 = vmatpush3.bf16.msra.mxu0 %v2442_v63 }
  0xe0   :  { %2181 = vmatprep.subr.bf16.mxu0 %v2595_v40 }
  0xe1   :  { %2150 = vmatpush3.bf16.msra.mxu1 %v2459_v10  ;;  %v2472_v10 = vld [vmem:[#allocation8 + $0x18] sm:$0xff]  }
  0xe2   :  { %1436 = vmatmul.mubr.bf16.vlgmr.msra.gmra.mxu0 %v2660_v37  ;;  %2201 = vmatprep.subr.bf16.mxu1 %v2595_v40 }
  0xe3   :  { %2197 = vmatprep.mubr.msk.bf16.mxu0 %vm2597_vm1, %v2595_v40  ;;  %2182 = vmatpush3.bf16.msra.mxu0 %v2460_v11  ;;  %v2473_v11 = vld [vmem:[#allocation8 + $0x10] sm:$0xff]  }
  0xe4   :  { %2183 = vmatprep.subr.bf16.mxu0 %v2595_v40 }
  0xe7   :  { %2184 = vmatpush3.bf16.msra.mxu0 %v2461_v12  ;;  %v2474_v12 = vld [vmem:[#allocation8 + $0x8] sm:$0xff]  }
  0xe8   :  { %2185 = vmatprep.subr.bf16.mxu0 %v2595_v40 }
  0xeb   :  { %2186 = vmatpush3.bf16.msra.mxu0 %v2462_v13  ;;  %v2475_v13 = vld [vmem:[#allocation8] sm:$0xff]  }
  0xec   :  { %2187 = vmatprep.subr.bf16.mxu0 %v2595_v40 }
  0xef   :  { %2188 = vmatpush3.bf16.msra.mxu0 %v2463_v14 }
  0xf0   :  { %2189 = vmatprep.subr.bf16.mxu0 %v2595_v40 }
  0xf3   :  { %2190 = vmatpush3.bf16.msra.mxu0 %v2464_v9 }
  0xf4   :  { %2191 = vmatprep.subr.bf16.mxu0 %v2595_v40 }
  0xf7   :  { %2192 = vmatpush3.bf16.msra.mxu0 %v2465_v15 }
  0xf8   :  { %2193 = vmatprep.subr.bf16.mxu0 %v2595_v40 }
  0xfb   :  { %2194 = vmatpush3.bf16.msra.mxu0 %v2466_v16 }
  0xfc   :  { %2195 = vmatprep.subr.bf16.mxu0 %v2595_v40 }
  0xff   :  { %2196 = vmatpush3.bf16.msra.mxu0 %v2467_v17 }
 0x13a   :  { %v1193_v18 = vpop.f32.mrf.mxu0 }
 0x13b   :  { %v1234_v19 = vpop.f32.mrf.mxu1 }
 0x13c   :  { %v1235_v20 = vadd.f32 %v1234_v19, %v1193_v18  ;;  %v1195_v21 = vpop.f32.mrf.mxu0 }
 0x13d   :  { %v1236_v22 = vpop.f32.mrf.mxu1 }
 0x13e   :  { %v1237_v24 = vadd.f32 %v1236_v22, %v1195_v21  ;;  %v1197_v25 = vpop.f32.mrf.mxu0 }
 0x13f   :  { %v1238_v26 = vpop.f32.mrf.mxu1 }
 0x140   :  { %v1198_v27 = vpop.f32.mrf.mxu0 }
 0x141   :  { %v1239_v28 = vpop.f32.mrf.mxu1 }
 0x15b   :  { %v2083_v29 = vpop.f32.mrf.mxu1 }
 0x15d   :  { %v2084_v30 = vpop.f32.mrf.mxu1 }
 0x15e   :  { %v2085_v31 = vadd.f32 %v2084_v30, %v2083_v29 }
 0x15f   :  { %v2086_v32 = vpop.f32.mrf.mxu1 }
 0x161   :  { %v2087_v33 = vpop.f32.mrf.mxu1 }
 0x17a   :  { %v1275_v34 = vpop.f32.mrf.mxu0 }
 0x17b   :  { %v2105_v35 = vpop.f32.mrf.mxu1  ;;  %v1276_v53 = vadd.f32 %v1275_v34, %v1235_v20 }
 0x17c   :  { %v1277_v36 = vpop.f32.mrf.mxu0 }
 0x17d   :  { %v2106_v37 = vpop.f32.mrf.mxu1  ;;  %v1278_v45 = vadd.f32 %v1277_v36, %v1237_v24 }
 0x17e   :  { %v1279_v38 = vpop.f32.mrf.mxu0  ;;  %v2107_v58 = vadd.f32 %v2106_v37, %v2105_v35 }
 0x17f   :  { %v2108_v39 = vpop.f32.mrf.mxu1 }
 0x180   :  { %v1280_v41 = vpop.f32.mrf.mxu0  ;;  %v1398_v61 = vadd.f32 %v2107_v58, %v2085_v31 }
 0x181   :  { %v2109_v42 = vpop.f32.mrf.mxu1 }
 0x182   :  { %v1316_v43 = vpop.f32.mrf.mxu0 }
 0x183   :  { %v1477_v44 = vpop.f32.mrf.mxu1  ;;  %v1317_v46 = vadd.f32 %v1316_v43, %v1276_v53 }
 0x184   :  { %v1318_v47 = vpop.f32.mrf.mxu0 }
 0x185   :  { %v2179_v48 = vpop.f32.mrf.mxu1  ;;  %v1319_v23 = vadd.f32 %v1318_v47, %v1278_v45  ;;  %v1483_v49 = vmax.f32 %v1317_v46, 0.0 }
 0x186   :  { %v1320_v50 = vpop.f32.mrf.mxu0 }
 0x187   :  { %v1480_v51 = vpop.f32.mrf.mxu1  ;;  %v1484_v52 = vmax.f32 %v1319_v23, 0.0  ;;  %v1486_v57 = vpack.c.bf16 %v1483_v49, %v1483_v49 }
 0x188   :  { %v1321_v54 = vpop.f32.mrf.mxu0 }
 0x189   :  { %v2180_v55 = vpop.f32.mrf.mxu1  ;;  %v1487_v56 = vpack.c.bf16 %v1484_v52, %v1484_v52 }
 0x18b   :  { %1713 = vmatprep.mubr.bf16.mxu1 %v1487_v56 }
 0x18c   :  { %1714 = vmatmul.mubr.bf16.vlgmr.msra.gmra.mxu1 %v1486_v57 }
 0x18d   :  { %2217 = vmatprep.mubr.msk.bf16.mxu1 %vm2597_vm1, %v2595_v40  ;;  %2202 = vmatpush3.bf16.msra.mxu1 %v2468_v5 }
 0x18e   :  { %2203 = vmatprep.subr.bf16.mxu1 %v2595_v40 }
 0x191   :  { %2204 = vmatpush3.bf16.msra.mxu1 %v2469_v6 }
 0x192   :  { %2205 = vmatprep.subr.bf16.mxu1 %v2595_v40 }
 0x195   :  { %2206 = vmatpush3.bf16.msra.mxu1 %v2470_v7 }
 0x196   :  { %2207 = vmatprep.subr.bf16.mxu1 %v2595_v40 }
 0x199   :  { %2208 = vmatpush3.bf16.msra.mxu1 %v2471_v8 }
 0x19a   :  { %2209 = vmatprep.subr.bf16.mxu1 %v2595_v40 }
 0x19d   :  { %2210 = vmatpush3.bf16.msra.mxu1 %v2472_v10 }
 0x19e   :  { %2211 = vmatprep.subr.bf16.mxu1 %v2595_v40 }
 0x1a1   :  { %2212 = vmatpush3.bf16.msra.mxu1 %v2473_v11 }
 0x1a2   :  { %v2127_v59 = vpop.f32.mrf.mxu0  ;;  %2213 = vmatprep.subr.bf16.mxu1 %v2595_v40 }
 0x1a4   :  { %v2128_v60 = vpop.f32.mrf.mxu0 }
 0x1a5   :  { %v2129_v62 = vadd.f32 %v2128_v60, %v2127_v59  ;;  %2214 = vmatpush3.bf16.msra.mxu1 %v2474_v12 }
 0x1a6   :  { %v2130_v63 = vpop.f32.mrf.mxu0  ;;  %2215 = vmatprep.subr.bf16.mxu1 %v2595_v40 }
 0x1a7   :  { %v1438_v0 = vadd.f32 %v2129_v62, %v1398_v61 }
 0x1a8   :  { %v2131_v1 = vpop.f32.mrf.mxu0 }
 0x1a9   :  { %v1478_v2 = vadd.f32 %v1477_v44, %v1438_v0  ;;  %2216 = vmatpush3.bf16.msra.mxu1 %v2475_v13 }
 0x1ab   :  { %v1485_v3 = vmax.f32 %v1478_v2, 0.0 }
 0x1ad   :  { %v1488_v4 = vpack.c.bf16 %v1485_v3, %v1485_v3 }
 0x1af   :  { %2198 = vmatmul.mubr.bf16.vlgmr.msra.gmra.mxu0 %v1488_v4 }
 0x24c   :  { %v2151_v14 = vpop.f32.mrf.mxu1 }
 0x24e   :  { %v2152_v9 = vpop.f32.mrf.mxu1 }
 0x24f   :  { %v2153_v17 = vadd.f32 %v2152_v9, %v2151_v14 }
 0x250   :  { %v2154_v15 = vpop.f32.mrf.mxu1 }
 0x252   :  { %v2155_v16 = vpop.f32.mrf.mxu1 }
 0x26f   :  { %v1755_v18 = vpop.f32.mrf.mxu0 }
 0x270   :  { %v1756_v19 = vadd.f32 %v2153_v17, %v1755_v18 }
 0x271   :  { %v2199_v20 = vpop.f32.mrf.mxu0 }
 0x272   :  { %v1761_v21 = vmax.f32 %v1756_v19, 0.0 }
 0x273   :  { %v1758_v22 = vpop.f32.mrf.mxu0 }
 0x274   :  { %v1762_v24 = vpack.c.bf16 %v1761_v21, %v1761_v21 }
 0x275   :  { %v2200_v25 = vpop.f32.mrf.mxu0 }
 0x276   :  { %2218 = vmatmul.mubr.bf16.vlgmr.msra.gmra.mxu1 %v1762_v24 }
 0x336   :  { %v1861_v26 = vpop.f32.mrf.mxu1 }
 0x337   :  { %v1867_v27 = vpack.c.bf16 %v1861_v26, %v1861_v26 }
 0x338   :  { %v2219_v40 = vpop.f32.mrf.mxu1 }
 0x339   :  { %1868 = vst [vmem:[#allocation10] sm:$0xf] %v1867_v27 }
 0x33a   :  { %v1864_v28 = vpop.f32.mrf.mxu1 }
 0x33b   :  { %2567 = shalt.err (!%p2564_p10)
}
 0x33c   :  { %1878 = dma.vmem_to_hbm [thread:$0]  %s1876_s3, 64, %s2698_s4, [#allocation4]   ;;  %v2220_v29 = vpop.f32.mrf.mxu1 }
 0x33d   :  { %2582 = dma.done.wait [#allocation4], 64  }
 0x33e   :  { %2583 = vsyncadd [#allocation4], 4294967232 }
 0x33f   :  { %1882 = vsyncpa [#allocation3], 1 }
 0x340   :  { %1883 = vsyncpa [#allocation6], 1 }
 0x341   :  { %1884 = vsyncpa [#allocation9], 1 }
 0x342   :  { %1885 = vsyncpa [#allocation4], 1 }

</bundles_post_ra>
